<compile_context>
chip_gen: v5e
topology: v5e:2x2
jax: 0.10.0
libtpu: 0.0.40
codegen_flags: <defaults>
</compile_context>

<pallas_src>
import jax
import jax.numpy as jnp
from jax.experimental import pallas as pl
from jax.experimental.pallas import tpu as pltpu

_SUBLANE = 8  # vreg sublane width (batch tiles are multiples of this)


def _round_up(n, m):
    return ((n + m - 1) // m) * m


def _pick_batch_tile(B, block_batch):
    """Pick a batch tile: multiple of 8, <= block_batch, minimal padding,
    and >= 2 grid steps when that costs no extra padding (v7x megacore)."""
    b8 = _round_up(max(B, 1), _SUBLANE)
    tb = min(_round_up(block_batch, _SUBLANE), b8)
    # Prefer a tile that divides the sublane-rounded batch (no wasted rows).
    cand = tb
    while cand > _SUBLANE and b8 % cand != 0:
        cand -= _SUBLANE
    if b8 % cand == 0:
        tb = cand
    # Keep >= 2 grid steps when it adds no padding, so ("parallel",) can use
    # both TensorCores on v7x.
    if b8 // tb < 2 and tb > _SUBLANE:
        half = _round_up(tb // 2, _SUBLANE)
        if _round_up(b8, half) <= _round_up(b8, tb):
            tb = half
    return tb


def _mlp_kernel(x_ref, w1_ref, b1_ref, w2_ref, b2_ref, w3_ref, b3_ref, o_ref):
    # Weights define the MXU input dtype (bf16 in the fast path, f32 otherwise).
    mxu_dtype = w1_ref.dtype

    # Layer 1: fc1 + ReLU (CBPLinear cbp1 is identity in forward).
    h1 = jnp.dot(x_ref[...].astype(mxu_dtype), w1_ref[...],
                 preferred_element_type=jnp.float32)
    h1 = jnp.maximum(h1 + b1_ref[...], 0.0)          # f32 epilogue

    # Layer 2: fc2 + ReLU (CBPLinear cbp2 is identity in forward).
    h2 = jnp.dot(h1.astype(mxu_dtype), w2_ref[...],
                 preferred_element_type=jnp.float32)
    h2 = jnp.maximum(h2 + b2_ref[...], 0.0)          # f32 epilogue

    # Layer 3: fc3 (no activation).
    out = jnp.dot(h2.astype(mxu_dtype), w3_ref[...],
                  preferred_element_type=jnp.float32)
    o_ref[...] = (out + b3_ref[...]).astype(o_ref.dtype)


def cbp_simple_mlp_forward(x, w1, b1, w2, b2, w3, b3, *,
                           block_batch=512, use_bf16=True):
    """x: [B, F]; w_i: [in, out] (transposed from PyTorch's [out, in]);
    b_i: [out].  Returns [B, num_targets]."""
    B, F = x.shape
    H = w1.shape[1]
    T = w3.shape[1]

    TB = _pick_batch_tile(B, block_batch)
    Bp = _round_up(B, TB)
    grid = (Bp // TB,)

    # Only the batch axis is ever padded (feature/hidden/target dims are used
    # as full-array block dims, which is always a legal BlockSpec).
    xp = x if Bp == B else jnp.pad(x, ((0, Bp - B), (0, 0)))

    mxu_dtype = jnp.bfloat16 if use_bf16 else jnp.float32
    w1c = w1.astype(mxu_dtype)
    w2c = w2.astype(mxu_dtype)
    w3c = w3.astype(mxu_dtype)
    b1r = b1.astype(jnp.float32).reshape(1, H)
    b2r = b2.astype(jnp.float32).reshape(1, H)
    b3r = b3.astype(jnp.float32).reshape(1, T)

    # Cost estimate from true shapes (advisory for XLA's scheduler).
    w_bytes = jnp.dtype(mxu_dtype).itemsize
    flops = 2 * B * (F * H + H * H + H * T)
    bytes_accessed = (
        B * F * x.dtype.itemsize
        + (F * H + H * H + H * T) * w_bytes
        + (2 * H + T) * 4
        + B * T * x.dtype.itemsize
    )

    # Explicit scoped-VMEM budget (v5e default is 16 MiB): double-buffered
    # activation/output tiles + resident weights (2 pipeline buffers each).
    vmem_need = (
        2 * TB * F * xp.dtype.itemsize
        + 2 * TB * T * x.dtype.itemsize
        + 2 * ((F * H + H * H + H * T) * w_bytes + (2 * H + T) * 4)
    )
    vmem_limit = int(min(64 * 2**20, max(32 * 2**20, 2 * vmem_need)))

    out = pl.pallas_call(
        _mlp_kernel,
        out_shape=jax.ShapeDtypeStruct((Bp, T), x.dtype),
        grid=grid,
        in_specs=[
            # Activation tile streams per grid step (double-buffered).
            pl.BlockSpec((TB, F), lambda i: (i, 0)),
            # Weights / biases: index_maps independent of i -> DMA'd once,
            # resident in VMEM across all batch tiles.
            pl.BlockSpec((F, H), lambda i: (0, 0)),
            pl.BlockSpec((1, H), lambda i: (0, 0)),
            pl.BlockSpec((H, H), lambda i: (0, 0)),
            pl.BlockSpec((1, H), lambda i: (0, 0)),
            pl.BlockSpec((H, T), lambda i: (0, 0)),
            pl.BlockSpec((1, T), lambda i: (0, 0)),
        ],
        out_specs=pl.BlockSpec((TB, T), lambda i: (i, 0)),
        compiler_params=pltpu.CompilerParams(
            dimension_semantics=("parallel",),
            vmem_limit_bytes=vmem_limit,
        ),
        cost_estimate=pl.CostEstimate(
            flops=flops, transcendentals=0, bytes_accessed=bytes_accessed),
    )(xp, w1c, b1r, w2c, b2r, w3c, b3r)

    return out if Bp == B else out[:B]


def _init_linear(key, fan_in, fan_out):
    # Mimics nn.Linear default init: uniform(-1/sqrt(fan_in), 1/sqrt(fan_in)).
    kw, kb = jax.random.split(key)
    bound = 1.0 / jnp.sqrt(fan_in)
    # Stored as [in, out] (transpose of PyTorch's [out, in]).
    w = jax.random.uniform(kw, (fan_in, fan_out), jnp.float32, -bound, bound)
    b = jax.random.uniform(kb, (fan_out,), jnp.float32, -bound, bound)
    return w, b


def _reference(x, w1, b1, w2, b2, w3, b3):
    h1 = jnp.maximum(x @ w1 + b1, 0.0)
    h2 = jnp.maximum(h1 @ w2 + b2, 0.0)
    return h2 @ w3 + b3


if __name__ == "__main__":
    batch = 256          # 2 grid steps of 128 -> exercises batch tiling
    num_features = 32
    num_hidden = 32
    num_targets = 16

    key = jax.random.PRNGKey(0)
    kx, k1, k2, k3 = jax.random.split(key, 4)

    x = jax.random.normal(kx, (batch, num_features), jnp.float32)
    w1, b1 = _init_linear(k1, num_features, num_hidden)
    w2, b2 = _init_linear(k2, num_hidden, num_hidden)
    w3, b3 = _init_linear(k3, num_hidden, num_targets)

    ref = _reference(x, w1, b1, w2, b2, w3, b3)

    # f32 MXU path: bit-for-bit-ish against the reference.
    out_f32 = cbp_simple_mlp_forward(x, w1, b1, w2, b2, w3, b3,
                                     block_batch=128, use_bf16=False)
    out_f32 = jax.block_until_ready(out_f32)
    assert out_f32.shape == (batch, num_targets)
    assert jnp.allclose(out_f32, ref, atol=1e-5, rtol=1e-5)

    # bf16 MXU path (production default): expected bf16 rounding error only.
    out_bf16 = cbp_simple_mlp_forward(x, w1, b1, w2, b2, w3, b3,
                                      block_batch=128, use_bf16=True)
    out_bf16 = jax.block_until_ready(out_bf16)
    assert out_bf16.shape == (batch, num_targets)
    assert jnp.allclose(out_bf16, ref, atol=5e-2, rtol=5e-2)

    print("KERNEL_OK")
</pallas_src>

<mosaic_0001>
module attributes {stable_mosaic.version = 11 : i64} {
  func.func @_mlp_kernel(%arg0: i32, %arg1: memref<128x32xf32, #tpu.memory_space<vmem>>, %arg2: memref<32x32xf32, #tpu.memory_space<vmem>>, %arg3: memref<1x32xf32, #tpu.memory_space<vmem>>, %arg4: memref<32x32xf32, #tpu.memory_space<vmem>>, %arg5: memref<1x32xf32, #tpu.memory_space<vmem>>, %arg6: memref<32x16xf32, #tpu.memory_space<vmem>>, %arg7: memref<1x16xf32, #tpu.memory_space<vmem>>, %arg8: memref<128x16xf32, #tpu.memory_space<vmem>>) attributes {dimension_semantics = [#tpu.dimension_semantics<parallel>], iteration_bounds = array<i64: 2>, scalar_prefetch = 0 : i64, scratch_operands = 0 : i64, tpu.core_type = #tpu.core_type<tc>, window_params = [{transform_indices = @transform_0, window_bounds = array<i64: 128, 32>}, {pipeline_mode = #tpu.pipeline_mode<synchronous>, transform_indices = @transform_1, window_bounds = array<i64: 32, 32>}, {pipeline_mode = #tpu.pipeline_mode<synchronous>, transform_indices = @transform_2, window_bounds = array<i64: 1, 32>}, {pipeline_mode = #tpu.pipeline_mode<synchronous>, transform_indices = @transform_3, window_bounds = array<i64: 32, 32>}, {pipeline_mode = #tpu.pipeline_mode<synchronous>, transform_indices = @transform_4, window_bounds = array<i64: 1, 32>}, {pipeline_mode = #tpu.pipeline_mode<synchronous>, transform_indices = @transform_5, window_bounds = array<i64: 32, 16>}, {pipeline_mode = #tpu.pipeline_mode<synchronous>, transform_indices = @transform_6, window_bounds = array<i64: 1, 16>}, {transform_indices = @transform_7, window_bounds = array<i64: 128, 16>}]} {
    %c0 = arith.constant 0 : index
    %c0_0 = arith.constant 0 : index
    %0 = vector.load %arg1[%c0, %c0_0] : memref<128x32xf32, #tpu.memory_space<vmem>>, vector<128x32xf32>
    %c0_1 = arith.constant 0 : index
    %c0_2 = arith.constant 0 : index
    %1 = vector.load %arg2[%c0_1, %c0_2] : memref<32x32xf32, #tpu.memory_space<vmem>>, vector<32x32xf32>
    %cst = arith.constant dense<0.000000e+00> : vector<128x32xf32>
    %2 = tpu.matmul %0, %1, %cst {dimension_numbers = #tpu.dot_dimension_numbers<[1], [0], [0], [1], [0, 0, 1, 1], [], []>} : vector<128x32xf32>, vector<32x32xf32>, vector<128x32xf32> -> vector<128x32xf32>
    %c0_3 = arith.constant 0 : index
    %c0_4 = arith.constant 0 : index
    %3 = vector.load %arg3[%c0_3, %c0_4] : memref<1x32xf32, #tpu.memory_space<vmem>>, vector<1x32xf32>
    %4 = vector.broadcast %3 : vector<1x32xf32> to vector<128x32xf32>
    %5 = arith.addf %2, %4 : vector<128x32xf32>
    %cst_5 = arith.constant 0.000000e+00 : f32
    %6 = vector.broadcast %cst_5 : f32 to vector<128x32xf32>
    %7 = arith.maximumf %5, %6 : vector<128x32xf32>
    %c0_6 = arith.constant 0 : index
    %c0_7 = arith.constant 0 : index
    %8 = vector.load %arg4[%c0_6, %c0_7] : memref<32x32xf32, #tpu.memory_space<vmem>>, vector<32x32xf32>
    %cst_8 = arith.constant dense<0.000000e+00> : vector<128x32xf32>
    %9 = tpu.matmul %7, %8, %cst_8 {dimension_numbers = #tpu.dot_dimension_numbers<[1], [0], [0], [1], [0, 0, 1, 1], [], []>} : vector<128x32xf32>, vector<32x32xf32>, vector<128x32xf32> -> vector<128x32xf32>
    %c0_9 = arith.constant 0 : index
    %c0_10 = arith.constant 0 : index
    %10 = vector.load %arg5[%c0_9, %c0_10] : memref<1x32xf32, #tpu.memory_space<vmem>>, vector<1x32xf32>
    %11 = vector.broadcast %10 : vector<1x32xf32> to vector<128x32xf32>
    %12 = arith.addf %9, %11 : vector<128x32xf32>
    %cst_11 = arith.constant 0.000000e+00 : f32
    %13 = vector.broadcast %cst_11 : f32 to vector<128x32xf32>
    %14 = arith.maximumf %12, %13 : vector<128x32xf32>
    %c0_12 = arith.constant 0 : index
    %c0_13 = arith.constant 0 : index
    %15 = vector.load %arg6[%c0_12, %c0_13] : memref<32x16xf32, #tpu.memory_space<vmem>>, vector<32x16xf32>
    %cst_14 = arith.constant dense<0.000000e+00> : vector<128x16xf32>
    %16 = tpu.matmul %14, %15, %cst_14 {dimension_numbers = #tpu.dot_dimension_numbers<[1], [0], [0], [1], [0, 0, 1, 1], [], []>} : vector<128x32xf32>, vector<32x16xf32>, vector<128x16xf32> -> vector<128x16xf32>
    %c0_15 = arith.constant 0 : index
    %c0_16 = arith.constant 0 : index
    %17 = vector.load %arg7[%c0_15, %c0_16] : memref<1x16xf32, #tpu.memory_space<vmem>>, vector<1x16xf32>
    %18 = vector.broadcast %17 : vector<1x16xf32> to vector<128x16xf32>
    %19 = arith.addf %16, %18 : vector<128x16xf32>
    %c0_17 = arith.constant 0 : index
    %c0_18 = arith.constant 0 : index
    %20 = vector.load %arg8[%c0_17, %c0_18] : memref<128x16xf32, #tpu.memory_space<vmem>>, vector<128x16xf32>
    tpu.vector_store %arg8[%c0_17, %c0_18], %19 {strides = array<i32>} : memref<128x16xf32, #tpu.memory_space<vmem>>, vector<128x16xf32>,
    return
  }
  func.func @transform_0(%arg0: i32) -> (i32, i32) {
    %c0_i32 = arith.constant 0 : i32
    %c0_i32_0 = arith.constant 0 : i32
    return %arg0, %c0_i32 : i32, i32
  }
  func.func @transform_1(%arg0: i32) -> (i32, i32) {
    %c0_i32 = arith.constant 0 : i32
    %c0_i32_0 = arith.constant 0 : i32
    %c0_i32_1 = arith.constant 0 : i32
    return %c0_i32, %c0_i32_0 : i32, i32
  }
  func.func @transform_2(%arg0: i32) -> (i32, i32) {
    %c0_i32 = arith.constant 0 : i32
    %c0_i32_0 = arith.constant 0 : i32
    %c0_i32_1 = arith.constant 0 : i32
    return %c0_i32, %c0_i32_0 : i32, i32
  }
  func.func @transform_3(%arg0: i32) -> (i32, i32) {
    %c0_i32 = arith.constant 0 : i32
    %c0_i32_0 = arith.constant 0 : i32
    %c0_i32_1 = arith.constant 0 : i32
    return %c0_i32, %c0_i32_0 : i32, i32
  }
  func.func @transform_4(%arg0: i32) -> (i32, i32) {
    %c0_i32 = arith.constant 0 : i32
    %c0_i32_0 = arith.constant 0 : i32
    %c0_i32_1 = arith.constant 0 : i32
    return %c0_i32, %c0_i32_0 : i32, i32
  }
  func.func @transform_5(%arg0: i32) -> (i32, i32) {
    %c0_i32 = arith.constant 0 : i32
    %c0_i32_0 = arith.constant 0 : i32
    %c0_i32_1 = arith.constant 0 : i32
    return %c0_i32, %c0_i32_0 : i32, i32
  }
  func.func @transform_6(%arg0: i32) -> (i32, i32) {
    %c0_i32 = arith.constant 0 : i32
    %c0_i32_0 = arith.constant 0 : i32
    %c0_i32_1 = arith.constant 0 : i32
    return %c0_i32, %c0_i32_0 : i32, i32
  }
  func.func @transform_7(%arg0: i32) -> (i32, i32) {
    %c0_i32 = arith.constant 0 : i32
    %c0_i32_0 = arith.constant 0 : i32
    return %arg0, %c0_i32 : i32, i32
  }
}

</mosaic_0001>

<bundles_post_ra>
// kernel: tpu_custom_call.1
= control target key start
LH: loop header
LB: loop body
LE: loop exit
PB: predicated region body
PF: predicated region fallthrough
CT: control target
= control target key end

     0   :  { %s897_s24 = smov 0   ;;  %s1084_s0 = inlined_call_operand.vmem [shape: f32[256,32], index: 0, kind: input, shape index: {}]   ;;  %s1085_s1 = inlined_call_operand.vmem [shape: f32[32,32], index: 1, kind: input, shape index: {}]   ;;  %s1086_s2 = inlined_call_operand.vmem [shape: f32[1,32], index: 2, kind: input, shape index: {}]   ;;  %s1087_s3 = inlined_call_operand.vmem [shape: f32[32,32], index: 3, kind: input, shape index: {}]   ;;  %s1088_s4 = inlined_call_operand.vmem [shape: f32[1,32], index: 4, kind: input, shape index: {}]   ;;  %s1089_s5 = inlined_call_operand.vmem [shape: f32[32,16], index: 5, kind: input, shape index: {}]   ;;  %s1090_s6 = inlined_call_operand.vmem [shape: f32[1,16], index: 6, kind: input, shape index: {}]   ;;  %s1091_s7 = inlined_call_operand.vmem [shape: f32[256,16], index: 7, kind: output, shape index: {}]  }
   0x1 LB: > { %s767_s25 = sadd.s32 4294967295, %s855_s24   ;;  %p771_p0 = scmp.ge.s32.totalorder %s855_s24, 1  ;;  %s855_s24 = sphi %s897_s24, %s17_s24  }
   0x2   : > { %p238_p1 = scmp.lt.s32.totalorder %s855_s24, 3 }
   0x4   : > { %p239_p2 = pnand %p771_p0, %p238_p1 }
   0x5   : > { %s772_s30 = sshll.u32 (!%p239_p2), %s767_s25, 4 }
   0x6   : > { %242 = sbr.rel (%p239_p2) target bundleno = 502 (0x1f6), region = 48  ;;  %p271_p3 = scmp.lt.s32.totalorder (!%p239_p2), %s772_s30, 31 }
   0xb   : > { %v301_v0 = vld [vmem:[%s1085_s1 + $0x18] sm:$0xff]  ;;  %v300_v1 = vld [vmem:[%s1085_s1 + $0x10] sm:$0xff]  ;;  %v299_v2 = vld [vmem:[%s1085_s1 + $0x8] sm:$0xff]  ;;  %s1093_s30 = smov (!%p271_p3, %s772_s30), 31  ;;  %vm306_vm0 = vcmask 261120   ;;  %vm694_vm1 = vcmask 130048  }
   0xc   : > { %367 = vmatpush.msra.mxu0 %v301_v0  ;;  %826 = vmatpush.msra.mxu3 %v301_v0  ;;  %v298_v3 = vld [vmem:[%s1085_s1] sm:$0xff]  ;;  %s773_s12 = sshll.u32 %s1093_s30, 3  ;;  %v439_v16 = vld [vmem:[%s1087_s3 + $0x18] sm:$0xff]  ;;  %v438_v21 = vld [vmem:[%s1087_s3 + $0x10] sm:$0xff] }
   0xd   : > { %s925_s15 = scalar_lea.vmem %s1084_s0, %s773_s12  ;;  %504 = vmatpush.msra.mxu1 %v439_v16  ;;  %v437_v22 = vld [vmem:[%s1087_s3 + $0x8] sm:$0xff]  ;;  %v436_v23 = vld [vmem:[%s1087_s3] sm:$0xff]  ;;  %v576_v61 = vld [vmem:[%s1089_s5 + $0x18] sm:$0xff]  ;;  %s1047_s20 = scalar_lea.vmem %s1091_s7, %s773_s12 }
   0xe   : > { %368 = vmatpush.msra.mxu0 %v300_v1  ;;  %827 = vmatpush.msra.mxu3 %v300_v1  ;;  %v282_v4 = vld [vmem:[%s925_s15] sm:$0xff]  ;;  %v283_v5 = vld [vmem:[%s925_s15 + $0x8] sm:$0xff]  ;;  %v284_v6 = vld [vmem:[%s925_s15 + $0x10] sm:$0xff] }
   0xf   : > { %v294_v7 = vld [vmem:[%s925_s15 + $0x60] sm:$0xff]  ;;  %v285_v8 = vld [vmem:[%s925_s15 + $0x18] sm:$0xff]  ;;  %v295_v9 = vld [vmem:[%s925_s15 + $0x68] sm:$0xff]  ;;  %505 = vmatpush.msra.mxu1 %v438_v21  ;;  %641 = vmatpush.msra.mxu2 %v576_v61 }
  0x10   : > { %369 = vmatpush.msra.mxu0 %v299_v2  ;;  %828 = vmatpush.msra.mxu3 %v299_v2  ;;  %v286_v10 = vld [vmem:[%s925_s15 + $0x20] sm:$0xff]  ;;  %v296_v11 = vld [vmem:[%s925_s15 + $0x70] sm:$0xff]  ;;  %v287_v12 = vld [vmem:[%s925_s15 + $0x28] sm:$0xff] }
  0x11   : > { %v297_v13 = vld [vmem:[%s925_s15 + $0x78] sm:$0xff]  ;;  %v288_v14 = vld [vmem:[%s925_s15 + $0x30] sm:$0xff]  ;;  %v290_v17 = vld [vmem:[%s925_s15 + $0x40] sm:$0xff]  ;;  %506 = vmatpush.msra.mxu1 %v437_v22 }
  0x12   : > { %370 = vmatpush.msra.mxu0 %v298_v3  ;;  %829 = vmatpush.msra.mxu3 %v298_v3  ;;  %v289_v15 = vld [vmem:[%s925_s15 + $0x38] sm:$0xff]  ;;  %v291_v18 = vld [vmem:[%s925_s15 + $0x48] sm:$0xff]  ;;  %v292_v19 = vld [vmem:[%s925_s15 + $0x50] sm:$0xff] }
  0x13   : > { %776 = vmatmul.msk.f32.vlgmr.msra.gmra.mxu0 %vm306_vm0, %v282_v4  ;;  %788 = vmatmul.msk.f32.vlgmr.msra.gmra.mxu3 %vm306_vm0, %v294_v7  ;;  %v293_v20 = vld [vmem:[%s925_s15 + $0x58] sm:$0xff]  ;;  %v974_v24 = vld [vmem:[%s1086_s2] ss:$0 sm:$0xff] }
  0x14   : > { %830 = vmatpush.msrb.mxu3 %v439_v16  ;;  %507 = vmatpush.msra.mxu1 %v436_v23 }
  0x16   : > { %831 = vmatpush.msrb.mxu3 %v438_v21 }
  0x18   : > { %832 = vmatpush.msrb.mxu3 %v437_v22 }
  0x1a   : > { %833 = vmatpush.msrb.mxu3 %v436_v23 }
  0x1b   : > { %777 = vmatmul.msk.f32.gmra.mxu0 %vm306_vm0, %v283_v5  ;;  %789 = vmatmul.msk.f32.gmra.mxu3 %vm306_vm0, %v295_v9 }
  0x1c   : > { %834 = vmatpush.msra.mxu3 %v576_v61 }
  0x23   : > { %778 = vmatmul.msk.f32.gmra.mxu0 %vm306_vm0, %v284_v6  ;;  %790 = vmatmul.msk.f32.gmra.mxu3 %vm306_vm0, %v296_v11  ;;  %v574_v11 = vld [vmem:[%s1089_s5 + $0x8] sm:$0xff] }
  0x2b   : > { %779 = vmatmul.msk.f32.gmra.mxu0 %vm306_vm0, %v285_v8  ;;  %791 = vmatmul.msk.f32.gmra.mxu3 %vm306_vm0, %v297_v13  ;;  %v847_v13 = vld [vmem:[%s1088_s4] ss:$0 sm:$0xff] }
  0x33   : > { %780 = vmatmul.msk.f32.gmra.mxu0 %vm306_vm0, %v286_v10  ;;  %v575_v10 = vld [vmem:[%s1089_s5 + $0x10] sm:$0xff] }
  0x34   : > { %642 = vmatpush.msra.mxu2 %v575_v10  ;;  %835 = vmatpush.msra.mxu3 %v575_v10 }
  0x36   : > { %643 = vmatpush.msra.mxu2 %v574_v11  ;;  %836 = vmatpush.msra.mxu3 %v574_v11 }
  0x3b   : > { %781 = vmatmul.msk.f32.gmra.mxu0 %vm306_vm0, %v287_v12  ;;  %v573_v12 = vld [vmem:[%s1089_s5] sm:$0xff] }
  0x3c   : > { %644 = vmatpush.msra.mxu2 %v573_v12  ;;  %837 = vmatpush.msra.mxu3 %v573_v12 }
  0x43   : > { %782 = vmatmul.msk.f32.gmra.mxu0 %vm306_vm0, %v288_v14 }
  0x4b   : > { %783 = vmatmul.msk.f32.gmra.mxu0 %vm306_vm0, %v289_v15 }
  0x53   : > { %784 = vmatmul.msk.f32.gmra.mxu0 %vm306_vm0, %v290_v17 }
  0x5b   : > { %785 = vmatmul.msk.f32.gmra.mxu0 %vm306_vm0, %v291_v18 }
  0x63   : > { %786 = vmatmul.msk.f32.gmra.mxu0 %vm306_vm0, %v292_v19 }
  0x6b   : > { %787 = vmatmul.msk.f32.gmra.mxu0 %vm306_vm0, %v293_v20 }
  0x90   : > { %v372_v25 = vpop.f32.mrf.mxu0 }
  0x91   : > { %v373_v26 = vadd.f32 %v974_v24, %v372_v25 }
  0x93   : > { %v420_v27 = vmax.f32 %v373_v26, 0.0 }
  0x95   : > { %792 = vmatmul.msk.f32.vlgmr.msra.gmra.mxu1 %vm306_vm0, %v420_v27 }
  0x96   : > { %v408_v36 = vpop.f32.mrf.mxu3 }
  0x97   : > { %v409_v38 = vadd.f32 %v974_v24, %v408_v36 }
  0x98   : > { %v375_v28 = vpop.f32.mrf.mxu0 }
  0x99   : > { %v376_v29 = vadd.f32 %v974_v24, %v375_v28  ;;  %v432_v39 = vmax.f32 %v409_v38, 0.0 }
  0x9b   : > { %v421_v30 = vmax.f32 %v376_v29, 0.0  ;;  %804 = vmatmul.msk.f32.vlgmr.msrb.gmra.mxu3 %vm306_vm0, %v432_v39 }
  0x9d   : > { %793 = vmatmul.msk.f32.gmra.mxu1 %vm306_vm0, %v421_v30 }
  0x9e   : > { %v411_v42 = vpop.f32.mrf.mxu3 }
  0x9f   : > { %v412_v44 = vadd.f32 %v974_v24, %v411_v42 }
  0xa0   : > { %v378_v31 = vpop.f32.mrf.mxu0 }
  0xa1   : > { %v379_v32 = vadd.f32 %v974_v24, %v378_v31  ;;  %v433_v45 = vmax.f32 %v412_v44, 0.0 }
  0xa3   : > { %v422_v33 = vmax.f32 %v379_v32, 0.0  ;;  %805 = vmatmul.msk.f32.gmra.mxu3 %vm306_vm0, %v433_v45 }
  0xa5   : > { %794 = vmatmul.msk.f32.gmra.mxu1 %vm306_vm0, %v422_v33 }
  0xa6   : > { %v414_v48 = vpop.f32.mrf.mxu3 }
  0xa7   : > { %v415_v50 = vadd.f32 %v974_v24, %v414_v48 }
  0xa8   : > { %v381_v34 = vpop.f32.mrf.mxu0 }
  0xa9   : > { %v382_v35 = vadd.f32 %v974_v24, %v381_v34  ;;  %v434_v51 = vmax.f32 %v415_v50, 0.0 }
  0xab   : > { %v423_v37 = vmax.f32 %v382_v35, 0.0  ;;  %806 = vmatmul.msk.f32.gmra.mxu3 %vm306_vm0, %v434_v51 }
  0xad   : > { %795 = vmatmul.msk.f32.gmra.mxu1 %vm306_vm0, %v423_v37 }
  0xae   : > { %v417_v54 = vpop.f32.mrf.mxu3 }
  0xaf   : > { %v418_v56 = vadd.f32 %v974_v24, %v417_v54 }
  0xb0   : > { %v384_v40 = vpop.f32.mrf.mxu0 }
  0xb1   : > { %v385_v41 = vadd.f32 %v974_v24, %v384_v40  ;;  %v435_v57 = vmax.f32 %v418_v56, 0.0 }
  0xb3   : > { %v424_v43 = vmax.f32 %v385_v41, 0.0  ;;  %807 = vmatmul.msk.f32.gmra.mxu3 %vm306_vm0, %v435_v57 }
  0xb5   : > { %796 = vmatmul.msk.f32.gmra.mxu1 %vm306_vm0, %v424_v43 }
  0xb8   : > { %v387_v46 = vpop.f32.mrf.mxu0 }
  0xb9   : > { %v388_v47 = vadd.f32 %v974_v24, %v387_v46 }
  0xbb   : > { %v425_v49 = vmax.f32 %v388_v47, 0.0 }
  0xbd   : > { %797 = vmatmul.msk.f32.gmra.mxu1 %vm306_vm0, %v425_v49 }
  0xc0   : > { %v390_v52 = vpop.f32.mrf.mxu0 }
  0xc1   : > { %v391_v53 = vadd.f32 %v974_v24, %v390_v52 }
  0xc3   : > { %v426_v55 = vmax.f32 %v391_v53, 0.0 }
  0xc5   : > { %798 = vmatmul.msk.f32.gmra.mxu1 %vm306_vm0, %v426_v55 }
  0xc8   : > { %v393_v58 = vpop.f32.mrf.mxu0 }
  0xc9   : > { %v394_v59 = vadd.f32 %v974_v24, %v393_v58 }
  0xcb   : > { %v427_v60 = vmax.f32 %v394_v59, 0.0 }
  0xcd   : > { %799 = vmatmul.msk.f32.gmra.mxu1 %vm306_vm0, %v427_v60 }
  0xd0   : > { %v396_v62 = vpop.f32.mrf.mxu0 }
  0xd1   : > { %v397_v63 = vadd.f32 %v974_v24, %v396_v62  ;;  %v848_v62 = vld [vmem:[%s1090_s6] ss:$0 sm:$0xff] }
  0xd3   : > { %v428_v0 = vmax.f32 %v397_v63, 0.0 }
  0xd5   : > { %800 = vmatmul.msk.f32.gmra.mxu1 %vm306_vm0, %v428_v0 }
  0xd8   : > { %v399_v1 = vpop.f32.mrf.mxu0 }
  0xd9   : > { %v400_v2 = vadd.f32 %v974_v24, %v399_v1 }
  0xdb   : > { %v429_v3 = vmax.f32 %v400_v2, 0.0 }
  0xdd   : > { %801 = vmatmul.msk.f32.gmra.mxu1 %vm306_vm0, %v429_v3 }
  0xe0   : > { %v402_v4 = vpop.f32.mrf.mxu0 }
  0xe1   : > { %v403_v5 = vadd.f32 %v974_v24, %v402_v4 }
  0xe3   : > { %v430_v6 = vmax.f32 %v403_v5, 0.0 }
  0xe5   : > { %802 = vmatmul.msk.f32.gmra.mxu1 %vm306_vm0, %v430_v6 }
  0xe8   : > { %v405_v7 = vpop.f32.mrf.mxu0 }
  0xe9   : > { %v406_v8 = vadd.f32 %v974_v24, %v405_v7 }
  0xeb   : > { %v431_v9 = vmax.f32 %v406_v8, 0.0 }
  0xed   : > { %803 = vmatmul.msk.f32.gmra.mxu1 %vm306_vm0, %v431_v9 }
 0x112   : > { %v509_v14 = vpop.f32.mrf.mxu1 }
 0x113   : > { %v510_v15 = vadd.f32 %v847_v13, %v509_v14 }
 0x115   : > { %v557_v16 = vmax.f32 %v510_v15, 0.0 }
 0x117   : > { %808 = vmatmul.msk.f32.vlgmr.msra.gmra.mxu2 %vm306_vm0, %v557_v16 }
 0x11a   : > { %v512_v17 = vpop.f32.mrf.mxu1 }
 0x11b   : > { %v513_v18 = vadd.f32 %v847_v13, %v512_v17 }
 0x11d   : > { %v558_v19 = vmax.f32 %v513_v18, 0.0 }
 0x11e   : > { %v545_v27 = vpop.f32.mrf.mxu3 }
 0x11f   : > { %809 = vmatmul.msk.f32.gmra.mxu2 %vm306_vm0, %v558_v19  ;;  %v546_v29 = vadd.f32 %v847_v13, %v545_v27 }
 0x121   : > { %v569_v31 = vmax.f32 %v546_v29, 0.0 }
 0x122   : > { %v515_v20 = vpop.f32.mrf.mxu1 }
 0x123   : > { %v516_v21 = vadd.f32 %v847_v13, %v515_v20  ;;  %820 = vmatmul.msk.f32.vlgmr.msra.gmra.mxu3 %vm306_vm0, %v569_v31 }
 0x125   : > { %v559_v22 = vmax.f32 %v516_v21, 0.0 }
 0x126   : > { %v548_v33 = vpop.f32.mrf.mxu3 }
 0x127   : > { %810 = vmatmul.msk.f32.gmra.mxu2 %vm306_vm0, %v559_v22  ;;  %v549_v35 = vadd.f32 %v847_v13, %v548_v33 }
 0x129   : > { %v570_v37 = vmax.f32 %v549_v35, 0.0 }
 0x12a   : > { %v518_v23 = vpop.f32.mrf.mxu1 }
 0x12b   : > { %v519_v24 = vadd.f32 %v847_v13, %v518_v23  ;;  %821 = vmatmul.msk.f32.gmra.mxu3 %vm306_vm0, %v570_v37 }
 0x12d   : > { %v560_v25 = vmax.f32 %v519_v24, 0.0 }
 0x12e   : > { %v551_v39 = vpop.f32.mrf.mxu3 }
 0x12f   : > { %811 = vmatmul.msk.f32.gmra.mxu2 %vm306_vm0, %v560_v25  ;;  %v552_v41 = vadd.f32 %v847_v13, %v551_v39 }
 0x131   : > { %v571_v43 = vmax.f32 %v552_v41, 0.0 }
 0x132   : > { %v521_v26 = vpop.f32.mrf.mxu1 }
 0x133   : > { %v522_v28 = vadd.f32 %v847_v13, %v521_v26  ;;  %822 = vmatmul.msk.f32.gmra.mxu3 %vm306_vm0, %v571_v43 }
 0x135   : > { %v561_v30 = vmax.f32 %v522_v28, 0.0 }
 0x136   : > { %v554_v45 = vpop.f32.mrf.mxu3 }
 0x137   : > { %812 = vmatmul.msk.f32.gmra.mxu2 %vm306_vm0, %v561_v30  ;;  %v555_v47 = vadd.f32 %v847_v13, %v554_v45 }
 0x139   : > { %v572_v49 = vmax.f32 %v555_v47, 0.0 }
 0x13a   : > { %v524_v32 = vpop.f32.mrf.mxu1 }
 0x13b   : > { %v525_v34 = vadd.f32 %v847_v13, %v524_v32  ;;  %823 = vmatmul.msk.f32.gmra.mxu3 %vm306_vm0, %v572_v49 }
 0x13d   : > { %v562_v36 = vmax.f32 %v525_v34, 0.0 }
 0x13f   : > { %813 = vmatmul.msk.f32.gmra.mxu2 %vm306_vm0, %v562_v36 }
 0x142   : > { %v527_v38 = vpop.f32.mrf.mxu1 }
 0x143   : > { %v528_v40 = vadd.f32 %v847_v13, %v527_v38 }
 0x145   : > { %v563_v42 = vmax.f32 %v528_v40, 0.0 }
 0x147   : > { %814 = vmatmul.msk.f32.gmra.mxu2 %vm306_vm0, %v563_v42 }
 0x14a   : > { %v530_v44 = vpop.f32.mrf.mxu1 }
 0x14b   : > { %v531_v46 = vadd.f32 %v847_v13, %v530_v44 }
 0x14d   : > { %v564_v48 = vmax.f32 %v531_v46, 0.0 }
 0x14f   : > { %815 = vmatmul.msk.f32.gmra.mxu2 %vm306_vm0, %v564_v48 }
 0x152   : > { %v533_v50 = vpop.f32.mrf.mxu1 }
 0x153   : > { %v534_v51 = vadd.f32 %v847_v13, %v533_v50 }
 0x155   : > { %v565_v52 = vmax.f32 %v534_v51, 0.0 }
 0x157   : > { %816 = vmatmul.msk.f32.gmra.mxu2 %vm306_vm0, %v565_v52 }
 0x15a   : > { %v536_v53 = vpop.f32.mrf.mxu1 }
 0x15b   : > { %v537_v54 = vadd.f32 %v847_v13, %v536_v53 }
 0x15d   : > { %v566_v55 = vmax.f32 %v537_v54, 0.0 }
 0x15f   : > { %817 = vmatmul.msk.f32.gmra.mxu2 %vm306_vm0, %v566_v55 }
 0x162   : > { %v539_v56 = vpop.f32.mrf.mxu1 }
 0x163   : > { %v540_v57 = vadd.f32 %v847_v13, %v539_v56 }
 0x165   : > { %v567_v58 = vmax.f32 %v540_v57, 0.0 }
 0x167   : > { %818 = vmatmul.msk.f32.gmra.mxu2 %vm306_vm0, %v567_v58 }
 0x16a   : > { %v542_v59 = vpop.f32.mrf.mxu1 }
 0x16b   : > { %v543_v60 = vadd.f32 %v847_v13, %v542_v59 }
 0x16d   : > { %v568_v61 = vmax.f32 %v543_v60, 0.0 }
 0x16f   : > { %819 = vmatmul.msk.f32.gmra.mxu2 %vm306_vm0, %v568_v61 }
 0x19a   : > { %v646_v63 = vpop.f32.mrf.mxu2 }
 0x19b   : > { %v647_v0 = vadd.f32 %v848_v62, %v646_v63 }
 0x19d   : > { %695 = vst.msk [vmem:[%s1047_s20] sm:$0xff] %vm694_vm1, %v647_v0 }
 0x1a2   : > { %v649_v1 = vpop.f32.mrf.mxu2 }
 0x1a3   : > { %v650_v2 = vadd.f32 %v848_v62, %v649_v1 }
 0x1a5   : > { %696 = vst.msk [vmem:[%s1047_s20 + $0x8] sm:$0xff] %vm694_vm1, %v650_v2 }
 0x1a6   : > { %v682_v8 = vpop.f32.mrf.mxu3 }
 0x1a7   : > { %v683_v10 = vadd.f32 %v848_v62, %v682_v8 }
 0x1a9   : > { %707 = vst.msk [vmem:[%s1047_s20 + $0x60] sm:$0xff] %vm694_vm1, %v683_v10 }
 0x1aa   : > { %v652_v3 = vpop.f32.mrf.mxu2 }
 0x1ab   : > { %v653_v4 = vadd.f32 %v848_v62, %v652_v3 }
 0x1ad   : > { %697 = vst.msk [vmem:[%s1047_s20 + $0x10] sm:$0xff] %vm694_vm1, %v653_v4 }
 0x1ae   : > { %v685_v12 = vpop.f32.mrf.mxu3 }
 0x1af   : > { %v686_v14 = vadd.f32 %v848_v62, %v685_v12 }
 0x1b1   : > { %708 = vst.msk [vmem:[%s1047_s20 + $0x68] sm:$0xff] %vm694_vm1, %v686_v14 }
 0x1b2   : > { %v655_v5 = vpop.f32.mrf.mxu2 }
 0x1b3   : > { %v656_v6 = vadd.f32 %v848_v62, %v655_v5 }
 0x1b5   : > { %698 = vst.msk [vmem:[%s1047_s20 + $0x18] sm:$0xff] %vm694_vm1, %v656_v6 }
 0x1b6   : > { %v688_v16 = vpop.f32.mrf.mxu3 }
 0x1b7   : > { %v689_v18 = vadd.f32 %v848_v62, %v688_v16 }
 0x1b9   : > { %709 = vst.msk [vmem:[%s1047_s20 + $0x70] sm:$0xff] %vm694_vm1, %v689_v18 }
 0x1ba   : > { %v658_v7 = vpop.f32.mrf.mxu2 }
 0x1bb   : > { %v659_v9 = vadd.f32 %v848_v62, %v658_v7 }
 0x1bd   : > { %699 = vst.msk [vmem:[%s1047_s20 + $0x20] sm:$0xff] %vm694_vm1, %v659_v9 }
 0x1be   : > { %v691_v20 = vpop.f32.mrf.mxu3 }
 0x1bf   : > { %v692_v22 = vadd.f32 %v848_v62, %v691_v20 }
 0x1c1   : > { %710 = vst.msk [vmem:[%s1047_s20 + $0x78] sm:$0xff] %vm694_vm1, %v692_v22 }
 0x1c2   : > { %v661_v11 = vpop.f32.mrf.mxu2 }
 0x1c3   : > { %v662_v13 = vadd.f32 %v848_v62, %v661_v11 }
 0x1c5   : > { %700 = vst.msk [vmem:[%s1047_s20 + $0x28] sm:$0xff] %vm694_vm1, %v662_v13 }
 0x1ca   : > { %v664_v15 = vpop.f32.mrf.mxu2 }
 0x1cb   : > { %v665_v17 = vadd.f32 %v848_v62, %v664_v15 }
 0x1cd   : > { %701 = vst.msk [vmem:[%s1047_s20 + $0x30] sm:$0xff] %vm694_vm1, %v665_v17 }
 0x1d2   : > { %v667_v19 = vpop.f32.mrf.mxu2 }
 0x1d3   : > { %v668_v21 = vadd.f32 %v848_v62, %v667_v19 }
 0x1d5   : > { %702 = vst.msk [vmem:[%s1047_s20 + $0x38] sm:$0xff] %vm694_vm1, %v668_v21 }
 0x1da   : > { %v670_v23 = vpop.f32.mrf.mxu2 }
 0x1db   : > { %v671_v24 = vadd.f32 %v848_v62, %v670_v23 }
 0x1dd   : > { %703 = vst.msk [vmem:[%s1047_s20 + $0x40] sm:$0xff] %vm694_vm1, %v671_v24 }
 0x1e2   : > { %v673_v25 = vpop.f32.mrf.mxu2 }
 0x1e3   : > { %v674_v26 = vadd.f32 %v848_v62, %v673_v25 }
 0x1e5   : > { %704 = vst.msk [vmem:[%s1047_s20 + $0x48] sm:$0xff] %vm694_vm1, %v674_v26 }
 0x1ea   : > { %v676_v27 = vpop.f32.mrf.mxu2 }
 0x1eb   : > { %v677_v28 = vadd.f32 %v848_v62, %v676_v27 }
 0x1ed   : > { %705 = vst.msk [vmem:[%s1047_s20 + $0x50] sm:$0xff] %vm694_vm1, %v677_v28 }
 0x1f2   : > { %v679_v29 = vpop.f32.mrf.mxu2 }
 0x1f3   : > { %v680_v30 = vadd.f32 %v848_v62, %v679_v29 }
 0x1f5   : > { %706 = vst.msk [vmem:[%s1047_s20 + $0x58] sm:$0xff] %vm694_vm1, %v680_v30 }
 0x1f6 PF: > { %s17_s24 = sadd.s32 1, %s855_s24  }
 0x1f7   : > { %p14_p4 = scmp.ge.s32.totalorder %s17_s24, 4  }
 0x1f9   :  { %16 = sbr.rel (!%p14_p4) target bundleno = 1 (0x1), region = 78 }

</bundles_post_ra>
